<compile_context>
chip_gen: v7x
topology: tpu7x:2x2x1
jax: 0.10.0
libtpu: 0.0.40
codegen_flags: <defaults>
</compile_context>

<pallas_src>
import functools

import numpy as np
import jax
import jax.numpy as jnp
from jax import lax
from jax.experimental import pallas as pl
from jax.experimental.pallas import tpu as pltpu


# ----------------------------- Pallas kernel -------------------------------
def _ipnn_kernel(xT_ref, embT_ref, w_ext_ref, c1_ref, w2_ref, c2_ref,
                 w3_ref, b3_ref, out_ref, *, field_num, pairs):
    """Batch-on-lanes IPNN.  Shapes per grid step (TB = batch tile on lanes):
       xT (F, TB) int32   embT (D, Vpad)        w_ext (H1, F*D + P*D)
       c1 (H1, 1)         w2 (H2, H1)           c2 (H2, 1)
       w3 (H2, 1)         b3 (1,)  [SMEM]       out (1, TB)."""
    vocab_pad = embT_ref.shape[1]
    tb = xT_ref.shape[1]
    embT = embT_ref[...]                                            # (D, Vpad)

    # In-kernel embedding gather: one one-hot matmul per field on the MXU.
    iota = lax.broadcasted_iota(jnp.int32, (vocab_pad, tb), 0)      # (Vpad, TB)
    xe = []
    for f in range(field_num):
        idx = xT_ref[f:f + 1, :]                                    # (1, TB)
        onehot = (iota == idx).astype(jnp.float32)                  # (Vpad, TB)
        xe.append(jnp.dot(embT, onehot,
                          preferred_element_type=jnp.float32))      # (D, TB)

    # Un-reduced pairwise field products, stacked under xe^T.
    prods = [xe[i] * xe[j] for (i, j) in pairs]                     # P x (D, TB)
    z = jnp.concatenate(xe + prods, axis=0)                         # (F*D+P*D, TB)

    # Layer 1 (BN folded): a single K = F*D + P*D MXU pass does both the
    # d-reduction of the pairwise products and the pair weighting.
    h = jnp.dot(w_ext_ref[...], z, preferred_element_type=jnp.float32)
    h = jnp.maximum(h + c1_ref[...], 0.0)                           # (H1, TB)

    # Layer 2 (BN folded).
    h = jnp.dot(w2_ref[...], h, preferred_element_type=jnp.float32)
    h = jnp.maximum(h + c2_ref[...], 0.0)                           # (H2, TB)

    # Final Linear(H2, 1): VPU mul + sublane reduce (no width-1 MXU pass).
    out_ref[...] = (jnp.sum(w3_ref[...] * h, axis=0, keepdims=True)
                    + b3_ref[0])                                    # (1, TB)


# ------------------------------- wrapper ------------------------------------
def ipnn_retrain_forward(x, params, field_dim, *, tb=None):
    emb = params["embedding"]            # (feature_num, D) f32
    arch = params["arch"]                # (F,) f32 in {0,1}

    B, F = x.shape
    feature_num, D = emb.shape
    P = F * (F - 1) // 2

    if tb is None:                       # single grid step up to a few thousand
        tb = B if B <= 4096 else 2048
    tb = min(tb, B)
    assert B % tb == 0 and tb % 128 == 0, "batch tile must be lane-dense"

    # --- fold the 0/1 arch field mask into a transposed, lane-padded table ---
    row_field = np.repeat(np.arange(F), field_dim)                  # static
    emb_masked = emb * arch[jnp.asarray(row_field)][:, None]        # (feature_num, D)
    vocab_pad = ((feature_num + 127) // 128) * 128
    embT = jnp.zeros((D, vocab_pad), jnp.float32)
    embT = embT.at[:, :feature_num].set(emb_masked.T)               # (D, Vpad)

    # --- fold eval-mode BatchNorm into the Linear layers ----------------------
    eps = 1e-5

    def fold(w, b, g, beta, m, v):
        s = g / jnp.sqrt(v + eps)
        return w * s[:, None], (s * (b - m) + beta)[:, None]

    w1_eff, c1 = fold(params["w1"], params["b1"], params["bn1_g"],
                      params["bn1_b"], params["bn1_m"], params["bn1_v"])
    w2_eff, c2 = fold(params["w2"], params["b2"], params["bn2_g"],
                      params["bn2_b"], params["bn2_m"], params["bn2_v"])

    # Expand pairwise-product weights over the D latent positions so one MXU
    # dot handles both the d-reduction and the pair weighting.
    w1e = w1_eff[:, :F * D]                                         # (H1, F*D)
    w1p = w1_eff[:, F * D:]                                         # (H1, P)
    w_ext = jnp.concatenate([w1e, jnp.repeat(w1p, D, axis=1)], 1)   # (H1, F*D+P*D)

    w3_col = params["w3"].reshape(-1, 1)                            # (H2, 1)
    b3 = params["b3"].reshape(-1).astype(jnp.float32)               # (1,) -> SMEM

    xT = x.T.astype(jnp.int32)                                      # (F, B), tiny int32

    # torch calc_product order: row-major i < j (matches w1 column layout).
    pairs = tuple((i, j) for i in range(F) for j in range(i + 1, F))
    kernel = functools.partial(_ipnn_kernel, field_num=F, pairs=pairs)

    def const_spec(a):
        return pl.BlockSpec(a.shape, lambda i, _n=a.ndim: (0,) * _n)

    out = pl.pallas_call(
        kernel,
        out_shape=jax.ShapeDtypeStruct((1, B), jnp.float32),
        grid_spec=pltpu.PrefetchScalarGridSpec(
            num_scalar_prefetch=0,
            grid=(B // tb,),                                        # == 1 at B=256
            in_specs=[
                pl.BlockSpec((F, tb), lambda i: (0, i)),            # x^T, batch on lanes
                const_spec(embT),
                const_spec(w_ext), const_spec(c1),
                const_spec(w2_eff), const_spec(c2),
                const_spec(w3_col),
                pl.BlockSpec(memory_space=pltpu.MemorySpace.SMEM),  # b3 scalar
            ],
            out_specs=pl.BlockSpec((1, tb), lambda i: (0, i)),      # lane-dense scores
        ),
        compiler_params=pltpu.CompilerParams(
            dimension_semantics=("parallel",)),
    )(xT, embT, w_ext, c1, w2_eff, c2, w3_col, b3)

    return out[0]                        # score.squeeze(1) -> (B,)


# --------------------------- reference (pure JAX) ----------------------------
def ipnn_ref(x, params):
    emb = params["embedding"]; arch = params["arch"]
    xv = emb[x]                                                     # (B, F, D)
    xe = xv * arch[None, :, None]
    B, F, D = xe.shape
    rows = [i for i in range(F) for j in range(i + 1, F)]
    cols = [j for i in range(F) for j in range(i + 1, F)]
    product = jnp.sum(xe[:, rows, :] * xe[:, cols, :], axis=2)      # (B, P)
    h = jnp.concatenate([xe.reshape(B, F * D), product], axis=1)    # (B, F*D+P)
    eps = 1e-5

    def layer(h, w, b, g, beta, m, v):
        y = h @ w.T + b
        y = (y - m) / jnp.sqrt(v + eps) * g + beta
        return jnp.maximum(y, 0.0)

    h = layer(h, params["w1"], params["b1"],
              params["bn1_g"], params["bn1_b"], params["bn1_m"], params["bn1_v"])
    h = layer(h, params["w2"], params["b2"],
              params["bn2_g"], params["bn2_b"], params["bn2_m"], params["bn2_v"])
    score = h @ params["w3"].T + params["b3"]                       # (B, 1)
    return score[:, 0]


# ------------------------------- main ---------------------------------------
if __name__ == "__main__":
    # Module configuration (opt / arch of IPNN_retrain).
    field_dim = [10, 20, 30, 40]                # per-field vocab sizes
    F = len(field_dim)
    feature_num = sum(field_dim)                # 100
    D = 8                                       # latent_dim
    mlp_dims = (16, 16)
    B = 256                                     # batch (one lane-dense tile)

    arch_cont = np.array([0.5, -0.1, 1.2, 0.0], dtype=np.float32)
    arch = jnp.asarray(np.where(arch_cont > 0, 1, 0), dtype=jnp.float32)  # {1,0,1,0}

    key = jax.random.PRNGKey(0)
    keys = jax.random.split(key, 16)

    # Deterministic parameter init (shapes follow the torch module).
    xav = float(np.sqrt(6.0 / (feature_num + D)))
    embedding = jax.random.uniform(keys[0], (feature_num, D), jnp.float32, -xav, xav)

    in_dim = F * D + F * (F - 1) // 2           # 32 + 6 = 38
    h1, h2 = mlp_dims
    w1 = 0.1 * jax.random.normal(keys[1], (h1, in_dim), jnp.float32)   # torch (out, in)
    b1 = 0.01 * jax.random.normal(keys[2], (h1,), jnp.float32)
    w2 = 0.1 * jax.random.normal(keys[3], (h2, h1), jnp.float32)
    b2 = 0.01 * jax.random.normal(keys[4], (h2,), jnp.float32)
    w3 = 0.1 * jax.random.normal(keys[5], (1, h2), jnp.float32)
    b3 = 0.01 * jax.random.normal(keys[6], (1,), jnp.float32)

    # Non-trivial eval-mode BatchNorm running stats (exercises the fold).
    bn1_g = 1.0 + 0.1 * jax.random.normal(keys[7], (h1,), jnp.float32)
    bn1_b = 0.05 * jax.random.normal(keys[8], (h1,), jnp.float32)
    bn1_m = 0.1 * jax.random.normal(keys[9], (h1,), jnp.float32)
    bn1_v = 1.0 + 0.2 * jax.random.uniform(keys[10], (h1,), jnp.float32)
    bn2_g = 1.0 + 0.1 * jax.random.normal(keys[11], (h2,), jnp.float32)
    bn2_b = 0.05 * jax.random.normal(keys[12], (h2,), jnp.float32)
    bn2_m = 0.1 * jax.random.normal(keys[13], (h2,), jnp.float32)
    bn2_v = 1.0 + 0.2 * jax.random.uniform(keys[14], (h2,), jnp.float32)

    params = dict(
        embedding=embedding, arch=arch,
        w1=w1, b1=b1, w2=w2, b2=b2, w3=w3, b3=b3,
        bn1_g=bn1_g, bn1_b=bn1_b, bn1_m=bn1_m, bn1_v=bn1_v,
        bn2_g=bn2_g, bn2_b=bn2_b, bn2_m=bn2_m, bn2_v=bn2_v,
    )

    # Inputs: per-field local indices + offsets -> global feature indices.
    offsets = jnp.asarray(np.concatenate([[0], np.cumsum(field_dim)[:-1]]), jnp.int32)
    local = jax.random.randint(keys[15], (B, F), 0,
                               jnp.asarray(field_dim, jnp.int32)).astype(jnp.int32)
    x = local + offsets[None, :]                # (B, F) global indices

    score = ipnn_retrain_forward(x, params, field_dim)
    score = jax.block_until_ready(score)

    ref = ipnn_ref(x, params)
    np.testing.assert_allclose(np.asarray(score), np.asarray(ref), rtol=1e-4, atol=1e-4)

    print("KERNEL_OK")
</pallas_src>

<mosaic_0001>
module attributes {stable_mosaic.version = 11 : i64} {
  func.func @_ipnn_kernel(%arg0: i32, %arg1: memref<4x256xi32, #tpu.memory_space<vmem>>, %arg2: memref<8x128xf32, #tpu.memory_space<vmem>>, %arg3: memref<16x80xf32, #tpu.memory_space<vmem>>, %arg4: memref<16x1xf32, #tpu.memory_space<vmem>>, %arg5: memref<16x16xf32, #tpu.memory_space<vmem>>, %arg6: memref<16x1xf32, #tpu.memory_space<vmem>>, %arg7: memref<16x1xf32, #tpu.memory_space<vmem>>, %arg8: memref<1xf32, #tpu.memory_space<smem>>, %arg9: memref<1x256xf32, #tpu.memory_space<vmem>>) attributes {dimension_semantics = [#tpu.dimension_semantics<parallel>], iteration_bounds = array<i64: 1>, scalar_prefetch = 0 : i64, scratch_operands = 0 : i64, tpu.core_type = #tpu.core_type<tc>, window_params = [{transform_indices = @transform_0, window_bounds = array<i64: 4, 256>}, {pipeline_mode = #tpu.pipeline_mode<synchronous>, transform_indices = @transform_1, window_bounds = array<i64: 8, 128>}, {pipeline_mode = #tpu.pipeline_mode<synchronous>, transform_indices = @transform_2, window_bounds = array<i64: 16, 80>}, {pipeline_mode = #tpu.pipeline_mode<synchronous>, transform_indices = @transform_3, window_bounds = array<i64: 16, 1>}, {pipeline_mode = #tpu.pipeline_mode<synchronous>, transform_indices = @transform_4, window_bounds = array<i64: 16, 16>}, {pipeline_mode = #tpu.pipeline_mode<synchronous>, transform_indices = @transform_5, window_bounds = array<i64: 16, 1>}, {pipeline_mode = #tpu.pipeline_mode<synchronous>, transform_indices = @transform_6, window_bounds = array<i64: 16, 1>}, {transform_indices = @transform_7, window_bounds = array<i64: 1>}, {transform_indices = @transform_8, window_bounds = array<i64: 1, 256>}]} {
    %c0 = arith.constant 0 : index
    %c0_0 = arith.constant 0 : index
    %0 = vector.load %arg2[%c0, %c0_0] : memref<8x128xf32, #tpu.memory_space<vmem>>, vector<8x128xf32>
    %1 = tpu.iota {dimensions = array<i32: 0>} : vector<128x256xi32>
    %c0_1 = arith.constant 0 : index
    %c0_2 = arith.constant 0 : index
    %2 = vector.load %arg1[%c0_1, %c0_2] : memref<4x256xi32, #tpu.memory_space<vmem>>, vector<1x256xi32>
    %3 = vector.broadcast %2 : vector<1x256xi32> to vector<128x256xi32>
    %4 = arith.cmpi eq, %1, %3 : vector<128x256xi32>
    %5 = arith.extui %4 : vector<128x256xi1> to vector<128x256xi32>
    %6 = arith.sitofp %5 : vector<128x256xi32> to vector<128x256xf32>
    %cst = arith.constant dense<0.000000e+00> : vector<8x256xf32>
    %7 = tpu.matmul %0, %6, %cst {dimension_numbers = #tpu.dot_dimension_numbers<[1], [0], [0], [1], [0, 0, 1, 1], [], []>} : vector<8x128xf32>, vector<128x256xf32>, vector<8x256xf32> -> vector<8x256xf32>
    %c1 = arith.constant 1 : index
    %c0_3 = arith.constant 0 : index
    %8 = vector.load %arg1[%c1, %c0_3] : memref<4x256xi32, #tpu.memory_space<vmem>>, vector<1x256xi32>
    %9 = vector.broadcast %8 : vector<1x256xi32> to vector<128x256xi32>
    %10 = arith.cmpi eq, %1, %9 : vector<128x256xi32>
    %11 = arith.extui %10 : vector<128x256xi1> to vector<128x256xi32>
    %12 = arith.sitofp %11 : vector<128x256xi32> to vector<128x256xf32>
    %cst_4 = arith.constant dense<0.000000e+00> : vector<8x256xf32>
    %13 = tpu.matmul %0, %12, %cst_4 {dimension_numbers = #tpu.dot_dimension_numbers<[1], [0], [0], [1], [0, 0, 1, 1], [], []>} : vector<8x128xf32>, vector<128x256xf32>, vector<8x256xf32> -> vector<8x256xf32>
    %c2 = arith.constant 2 : index
    %c0_5 = arith.constant 0 : index
    %14 = vector.load %arg1[%c2, %c0_5] : memref<4x256xi32, #tpu.memory_space<vmem>>, vector<1x256xi32>
    %15 = vector.broadcast %14 : vector<1x256xi32> to vector<128x256xi32>
    %16 = arith.cmpi eq, %1, %15 : vector<128x256xi32>
    %17 = arith.extui %16 : vector<128x256xi1> to vector<128x256xi32>
    %18 = arith.sitofp %17 : vector<128x256xi32> to vector<128x256xf32>
    %cst_6 = arith.constant dense<0.000000e+00> : vector<8x256xf32>
    %19 = tpu.matmul %0, %18, %cst_6 {dimension_numbers = #tpu.dot_dimension_numbers<[1], [0], [0], [1], [0, 0, 1, 1], [], []>} : vector<8x128xf32>, vector<128x256xf32>, vector<8x256xf32> -> vector<8x256xf32>
    %c3 = arith.constant 3 : index
    %c0_7 = arith.constant 0 : index
    %20 = vector.load %arg1[%c3, %c0_7] : memref<4x256xi32, #tpu.memory_space<vmem>>, vector<1x256xi32>
    %21 = vector.broadcast %20 : vector<1x256xi32> to vector<128x256xi32>
    %22 = arith.cmpi eq, %1, %21 : vector<128x256xi32>
    %23 = arith.extui %22 : vector<128x256xi1> to vector<128x256xi32>
    %24 = arith.sitofp %23 : vector<128x256xi32> to vector<128x256xf32>
    %cst_8 = arith.constant dense<0.000000e+00> : vector<8x256xf32>
    %25 = tpu.matmul %0, %24, %cst_8 {dimension_numbers = #tpu.dot_dimension_numbers<[1], [0], [0], [1], [0, 0, 1, 1], [], []>} : vector<8x128xf32>, vector<128x256xf32>, vector<8x256xf32> -> vector<8x256xf32>
    %26 = arith.mulf %7, %13 : vector<8x256xf32>
    %27 = arith.mulf %7, %19 : vector<8x256xf32>
    %28 = arith.mulf %7, %25 : vector<8x256xf32>
    %29 = arith.mulf %13, %19 : vector<8x256xf32>
    %30 = arith.mulf %13, %25 : vector<8x256xf32>
    %31 = arith.mulf %19, %25 : vector<8x256xf32>
    %32 = tpu.concatenate %7, %13, %19, %25, %26, %27, %28, %29, %30, %31 in 0 : vector<8x256xf32>, vector<8x256xf32>, vector<8x256xf32>, vector<8x256xf32>, vector<8x256xf32>, vector<8x256xf32>, vector<8x256xf32>, vector<8x256xf32>, vector<8x256xf32>, vector<8x256xf32> -> vector<80x256xf32>
    %c0_9 = arith.constant 0 : index
    %c0_10 = arith.constant 0 : index
    %33 = vector.load %arg3[%c0_9, %c0_10] : memref<16x80xf32, #tpu.memory_space<vmem>>, vector<16x80xf32>
    %cst_11 = arith.constant dense<0.000000e+00> : vector<16x256xf32>
    %34 = tpu.matmul %33, %32, %cst_11 {dimension_numbers = #tpu.dot_dimension_numbers<[1], [0], [0], [1], [0, 0, 1, 1], [], []>} : vector<16x80xf32>, vector<80x256xf32>, vector<16x256xf32> -> vector<16x256xf32>
    %c0_12 = arith.constant 0 : index
    %c0_13 = arith.constant 0 : index
    %35 = vector.load %arg4[%c0_12, %c0_13] : memref<16x1xf32, #tpu.memory_space<vmem>>, vector<16x1xf32>
    %36 = vector.broadcast %35 : vector<16x1xf32> to vector<16x256xf32>
    %37 = arith.addf %34, %36 : vector<16x256xf32>
    %cst_14 = arith.constant 0.000000e+00 : f32
    %38 = vector.broadcast %cst_14 : f32 to vector<16x256xf32>
    %39 = arith.maximumf %37, %38 : vector<16x256xf32>
    %c0_15 = arith.constant 0 : index
    %c0_16 = arith.constant 0 : index
    %40 = vector.load %arg5[%c0_15, %c0_16] : memref<16x16xf32, #tpu.memory_space<vmem>>, vector<16x16xf32>
    %cst_17 = arith.constant dense<0.000000e+00> : vector<16x256xf32>
    %41 = tpu.matmul %40, %39, %cst_17 {dimension_numbers = #tpu.dot_dimension_numbers<[1], [0], [0], [1], [0, 0, 1, 1], [], []>} : vector<16x16xf32>, vector<16x256xf32>, vector<16x256xf32> -> vector<16x256xf32>
    %c0_18 = arith.constant 0 : index
    %c0_19 = arith.constant 0 : index
    %42 = vector.load %arg6[%c0_18, %c0_19] : memref<16x1xf32, #tpu.memory_space<vmem>>, vector<16x1xf32>
    %43 = vector.broadcast %42 : vector<16x1xf32> to vector<16x256xf32>
    %44 = arith.addf %41, %43 : vector<16x256xf32>
    %cst_20 = arith.constant 0.000000e+00 : f32
    %45 = vector.broadcast %cst_20 : f32 to vector<16x256xf32>
    %46 = arith.maximumf %44, %45 : vector<16x256xf32>
    %c0_21 = arith.constant 0 : index
    %c0_22 = arith.constant 0 : index
    %47 = vector.load %arg7[%c0_21, %c0_22] : memref<16x1xf32, #tpu.memory_space<vmem>>, vector<16x1xf32>
    %48 = vector.broadcast %47 : vector<16x1xf32> to vector<16x256xf32>
    %49 = arith.mulf %48, %46 : vector<16x256xf32>
    %cst_23 = arith.constant dense<0.000000e+00> : vector<256xf32>
    %50 = vector.multi_reduction <add>, %49, %cst_23 [0] : vector<16x256xf32> to vector<256xf32>
    %51 = vector.shape_cast %50 : vector<256xf32> to vector<1x256xf32>
    %c0_24 = arith.constant 0 : index
    %52 = memref.load %arg8[%c0_24] : memref<1xf32, #tpu.memory_space<smem>>
    %53 = vector.broadcast %52 : f32 to vector<1x256xf32>
    %54 = arith.addf %51, %53 : vector<1x256xf32>
    %c0_25 = arith.constant 0 : index
    %c0_26 = arith.constant 0 : index
    %55 = vector.load %arg9[%c0_25, %c0_26] : memref<1x256xf32, #tpu.memory_space<vmem>>, vector<1x256xf32>
    tpu.vector_store %arg9[%c0_25, %c0_26], %54 {strides = array<i32>} : memref<1x256xf32, #tpu.memory_space<vmem>>, vector<1x256xf32>,
    return
  }
  func.func @transform_0(%arg0: i32) -> (i32, i32) {
    %c0_i32 = arith.constant 0 : i32
    %c0_i32_0 = arith.constant 0 : i32
    return %c0_i32, %arg0 : i32, i32
  }
  func.func @transform_1(%arg0: i32) -> (i32, i32) {
    %c0_i32 = arith.constant 0 : i32
    %c0_i32_0 = arith.constant 0 : i32
    %c0_i32_1 = arith.constant 0 : i32
    return %c0_i32, %c0_i32_0 : i32, i32
  }
  func.func @transform_2(%arg0: i32) -> (i32, i32) {
    %c0_i32 = arith.constant 0 : i32
    %c0_i32_0 = arith.constant 0 : i32
    %c0_i32_1 = arith.constant 0 : i32
    return %c0_i32, %c0_i32_0 : i32, i32
  }
  func.func @transform_3(%arg0: i32) -> (i32, i32) {
    %c0_i32 = arith.constant 0 : i32
    %c0_i32_0 = arith.constant 0 : i32
    %c0_i32_1 = arith.constant 0 : i32
    return %c0_i32, %c0_i32_0 : i32, i32
  }
  func.func @transform_4(%arg0: i32) -> (i32, i32) {
    %c0_i32 = arith.constant 0 : i32
    %c0_i32_0 = arith.constant 0 : i32
    %c0_i32_1 = arith.constant 0 : i32
    return %c0_i32, %c0_i32_0 : i32, i32
  }
  func.func @transform_5(%arg0: i32) -> (i32, i32) {
    %c0_i32 = arith.constant 0 : i32
    %c0_i32_0 = arith.constant 0 : i32
    %c0_i32_1 = arith.constant 0 : i32
    return %c0_i32, %c0_i32_0 : i32, i32
  }
  func.func @transform_6(%arg0: i32) -> (i32, i32) {
    %c0_i32 = arith.constant 0 : i32
    %c0_i32_0 = arith.constant 0 : i32
    %c0_i32_1 = arith.constant 0 : i32
    return %c0_i32, %c0_i32_0 : i32, i32
  }
  func.func @transform_7(%arg0: i32) -> i32 {
    %c0_i32 = arith.constant 0 : i32
    %c0_i32_0 = arith.constant 0 : i32
    return %c0_i32 : i32
  }
  func.func @transform_8(%arg0: i32) -> (i32, i32) {
    %c0_i32 = arith.constant 0 : i32
    %c0_i32_0 = arith.constant 0 : i32
    return %c0_i32, %arg0 : i32, i32
  }
}

</mosaic_0001>

<bundles_post_ra>
// kernel: tpu_custom_call.1
= control target key start
LH: loop header
LB: loop body
LE: loop exit
PB: predicated region body
PF: predicated region fallthrough
CT: control target
= control target key end

     0   :  { %v32_v0 = vlaneseq  ;;  %v1489_v1 = vmov 0.0   ;;  %s2016_s0 = inlined_call_operand.vmem [shape: s32[4,256], index: 0, kind: input, shape index: {}]   ;;  %s2017_s1 = inlined_call_operand.vmem [shape: f32[8,128], index: 1, kind: input, shape index: {}]   ;;  %s2018_s2 = inlined_call_operand.vmem [shape: f32[16,80], index: 2, kind: input, shape index: {}]   ;;  %s2019_s3 = inlined_call_operand.vmem [shape: f32[16,1], index: 3, kind: input, shape index: {}]   ;;  %s2020_s4 = inlined_call_operand.vmem [shape: f32[16,16], index: 4, kind: input, shape index: {}]   ;;  %s2021_s5 = inlined_call_operand.vmem [shape: f32[16,1], index: 5, kind: input, shape index: {}]   ;;  %s2022_s6 = inlined_call_operand.vmem [shape: f32[16,1], index: 6, kind: input, shape index: {}]   ;;  %s2023_s7 = inlined_call_operand.<no memory space> [shape: f32[1], index: 7, kind: input, shape index: {}]   ;;  %s2024_s8 = inlined_call_operand.hbm [shape: f32[1,256], index: 8, kind: output, shape index: {}]  }
   0x1   :  { %218 = vmatprep.mubr.f32.mxu0 %v1489_v1  ;;  %395 = vmatprep.mubr.f32.mxu1 %v1489_v1 }
   0x2   :  { %14 = vsyncpa [#allocation4], 0  ;;  %v1542_v2 = vshrl.u32 %v32_v0, 7  ;;  %v49_v3 = vld [vmem:[%s2016_s0] ss:$4 sm:$0x3] }
   0x3   :  { %v1107_v4 = vld [vmem:[%s2016_s0 + $0x1] ss:$4 sm:$0x3]  ;;  %v1490_v14 = vmov 1.0|1.0   ;;  %v1491_v35 = vmov 0  }
   0x4   :  { %v1551_v5 = vadd.s32 8, %v1542_v2  ;;  %v1554_v6 = vsub.s32 1, %v1542_v2  ;;  %v1557_v7 = vsub.s32 0, %v1542_v2  ;;  %v1560_v8 = vadd.s32 16, %v1542_v2  ;;  %v1804_v33 = vld [vmem:[%s2017_s1] sm:$0xff]  ;;  %1463 = vset.pattern.permute.xlu0 %v1491_v35  ;;  %1464 = vset.pattern.permute.xlu1 %v1491_v35  ;;  %v771_v36 = vld [vmem:[%s2019_s3 + $0x8] sm:$0xff] }
   0x5   :  { %v1563_v9 = vadd.s32 24, %v1542_v2  ;;  %v1599_v15 = vadd.s32 32, %v1542_v2  ;;  %v1602_v16 = vadd.s32 40, %v1542_v2  ;;  %v1625_v17 = vadd.s32 48, %v1542_v2  ;;  %v770_v34 = vld [vmem:[%s2019_s3] sm:$0xff]  ;;  %s1493_s30 = smov [#allocation3]  }
   0x6   :  { %v1566_v10 = vrot.slane %v49_v3, %v1554_v6  ;;  %v1569_v11 = vrot.slane %v1107_v4, %v1554_v6  ;;  %v1572_v12 = vrot.slane %v49_v3, %v1557_v7  ;;  %v1575_v13 = vrot.slane %v1107_v4, %v1557_v7  ;;  %v1172_v27 = vld [vmem:[%s2016_s0 + $0x2] ss:$4 sm:$0x3]  ;;  %v1237_v28 = vld [vmem:[%s2016_s0 + $0x3] ss:$4 sm:$0x3]  ;;  %774 = vperm.xlu0 %1463, %v770_v34  }
   0x7   :  { %v1628_v18 = vadd.s32 56, %v1542_v2  ;;  %v1651_v19 = vadd.s32 64, %v1542_v2  ;;  %v1654_v20 = vadd.s32 72, %v1542_v2  ;;  %v1677_v21 = vadd.s32 80, %v1542_v2  ;;  %v972_v37 = vld [vmem:[%s2022_s6] sm:$0xff]  ;;  %s1035_s9 = sshll.u32 %s1493_s30, 4  ;;  %s1036_s9 = int_to_ptr.vmem [resolvable:$true] %s1035_s9 }
   0x8   :  { %vm59_vm0 = vcmp.eq.s32.totalorder %v1542_v2, %v1566_v10  ;;  %vm61_vm1 = vcmp.eq.s32.totalorder %v1551_v5, %v1566_v10  ;;  %vm236_vm2 = vcmp.eq.s32.totalorder %v1542_v2, %v1569_v11  ;;  %vm238_vm3 = vcmp.eq.s32.totalorder %v1551_v5, %v1569_v11  ;;  %s1465_s10 = scalar_lea.vmem %s1036_s9, 32  ;;  %p1470_p1 = scmp.lt.s32.totalorder %s1036_s9, %s1036_s9 }
   0x9   :  { %vm1306_vm4 = vmpackc.low %vm61_vm1, %vm59_vm0  ;;  %vm58_vm5 = vcmp.eq.s32.totalorder %v1542_v2, %v1572_v12  ;;  %vm60_vm6 = vcmp.eq.s32.totalorder %v1551_v5, %v1572_v12  ;;  %vm235_vm7 = vcmp.eq.s32.totalorder %v1542_v2, %v1575_v13  ;;  %vm237_vm8 = vcmp.eq.s32.totalorder %v1551_v5, %v1575_v13  ;;  %p1466_p0 = scmp.ne.s32.totalorder %s1036_s9, %s1465_s10  ;;  %p1471_p2 = scmp.lt.s32.totalorder %s1465_s10, %s1465_s10 }
   0xa   :  { %1307 = vmatprep.subr.msk.bf16.mxu0 %vm1306_vm4, %v1490_v14  ;;  %vm1338_vm9 = vmpackc.low %vm238_vm3, %vm236_vm2  ;;  %vm63_vm10 = vcmp.eq.s32.totalorder %v1560_v8, %v1566_v10  ;;  %vm65_vm11 = vcmp.eq.s32.totalorder %v1563_v9, %v1566_v10  ;;  %vm240_vm13 = vcmp.eq.s32.totalorder %v1560_v8, %v1569_v11  ;;  %vm242_vm14 = vcmp.eq.s32.totalorder %v1563_v9, %v1569_v11 }
   0xb   :  { %1339 = vmatprep.subr.msk.bf16.mxu1 %vm1338_vm9, %v1490_v14  ;;  %vm1308_vm12 = vmpackc.low %vm60_vm6, %vm58_vm5  ;;  %vm62_vm0 = vcmp.eq.s32.totalorder %v1560_v8, %v1572_v12  ;;  %vm64_vm1 = vcmp.eq.s32.totalorder %v1563_v9, %v1572_v12  ;;  %vm239_vm3 = vcmp.eq.s32.totalorder %v1560_v8, %v1575_v13  ;;  %vm241_vm4 = vcmp.eq.s32.totalorder %v1563_v9, %v1575_v13  ;;  %p1472_p3 = por %p1471_p2, %p1470_p1 }
   0xc   :  { %1309 = vmatpush1.bf16.msk.msra.mxu0 %vm1308_vm12, %v1490_v14  ;;  %vm1340_vm15 = vmpackc.low %vm237_vm8, %vm235_vm7  ;;  %vm67_vm6 = vcmp.eq.s32.totalorder %v1599_v15, %v1566_v10  ;;  %vm69_vm7 = vcmp.eq.s32.totalorder %v1602_v16, %v1566_v10  ;;  %vm244_vm9 = vcmp.eq.s32.totalorder %v1599_v15, %v1569_v11  ;;  %vm66_vm12 = vcmp.eq.s32.totalorder %v1599_v15, %v1572_v12 }
   0xd   :  { %1341 = vmatpush1.bf16.msk.msra.mxu1 %vm1340_vm15, %v1490_v14  ;;  %vm1310_vm2 = vmpackc.low %vm65_vm11, %vm63_vm10  ;;  %vm246_vm10 = vcmp.eq.s32.totalorder %v1602_v16, %v1569_v11  ;;  %vm243_vm15 = vcmp.eq.s32.totalorder %v1599_v15, %v1575_v13  ;;  %v1680_v22 = vadd.s32 88, %v1542_v2  ;;  %v1703_v23 = vadd.s32 96, %v1542_v2  ;;  %779 = vperm.xlu0 %1463, %v771_v36   ;;  %p1473_p4 = pnand %p1472_p3, %p1466_p0 }
   0xe   :  { %1311 = vmatprep.subr.msk.bf16.mxu0 %vm1310_vm2, %v1490_v14  ;;  %vm1342_vm5 = vmpackc.low %vm242_vm14, %vm240_vm13  ;;  %vm68_vm13 = vcmp.eq.s32.totalorder %v1602_v16, %v1572_v12  ;;  %vm71_vm2 = vcmp.eq.s32.totalorder %v1625_v17, %v1566_v10  ;;  %v1706_v24 = vadd.s32 104, %v1542_v2  ;;  %v1729_v25 = vadd.s32 112, %v1542_v2 }
   0xf   :  { %1343 = vmatprep.subr.msk.bf16.mxu1 %vm1342_vm5, %v1490_v14  ;;  %vm1312_vm8 = vmpackc.low %vm64_vm1, %vm62_vm0  ;;  %vm245_vm0 = vcmp.eq.s32.totalorder %v1602_v16, %v1575_v13  ;;  %vm248_vm5 = vcmp.eq.s32.totalorder %v1625_v17, %v1569_v11  ;;  %v1732_v26 = vadd.s32 120, %v1542_v2  ;;  %v1764_v29 = vrot.slane %v1172_v27, %v1554_v6 }
  0x10   :  { %1313 = vmatpush1.bf16.msk.msra.mxu0 %vm1312_vm8, %v1490_v14  ;;  %vm1344_vm11 = vmpackc.low %vm241_vm4, %vm239_vm3  ;;  %vm73_vm3 = vcmp.eq.s32.totalorder %v1628_v18, %v1566_v10  ;;  %vm70_vm8 = vcmp.eq.s32.totalorder %v1625_v17, %v1572_v12  ;;  %v1772_v30 = vrot.slane %v1237_v28, %v1554_v6  ;;  %v1780_v31 = vrot.slane %v1172_v27, %v1557_v7 }
  0x11   :  { %1345 = vmatpush1.bf16.msk.msra.mxu1 %vm1344_vm11, %v1490_v14  ;;  %vm1314_vm14 = vmpackc.low %vm69_vm7, %vm67_vm6  ;;  %vm250_vm6 = vcmp.eq.s32.totalorder %v1628_v18, %v1569_v11  ;;  %vm247_vm11 = vcmp.eq.s32.totalorder %v1625_v17, %v1575_v13  ;;  %v1788_v32 = vrot.slane %v1237_v28, %v1557_v7  ;;  %976 = vperm.xlu0 %1463, %v972_v37   ;;  %v768_v7 = vld [vmem:[%s2018_s2] sm:$0xff] }
  0x12   :  { %1315 = vmatprep.subr.msk.bf16.mxu0 %vm1314_vm14, %v1490_v14  ;;  %vm1346_vm1 = vmpackc.low %vm246_vm10, %vm244_vm9  ;;  %vm72_vm9 = vcmp.eq.s32.totalorder %v1628_v18, %v1572_v12  ;;  %vm75_vm14 = vcmp.eq.s32.totalorder %v1651_v19, %v1566_v10  ;;  %v870_v28 = vld [vmem:[%s2020_s4] sm:$0xff] }
  0x13   :  { %1347 = vmatprep.subr.msk.bf16.mxu1 %vm1346_vm1, %v1490_v14  ;;  %vm1316_vm4 = vmpackc.low %vm68_vm13, %vm66_vm12  ;;  %vm249_vm12 = vcmp.eq.s32.totalorder %v1628_v18, %v1575_v13  ;;  %vm252_vm1 = vcmp.eq.s32.totalorder %v1651_v19, %v1569_v11 }
  0x14   :  { %1317 = vmatpush1.bf16.msk.msra.mxu0 %vm1316_vm4, %v1490_v14  ;;  %vm1348_vm7 = vmpackc.low %vm245_vm0, %vm243_vm15  ;;  %vm77_vm15 = vcmp.eq.s32.totalorder %v1654_v20, %v1566_v10  ;;  %vm74_vm4 = vcmp.eq.s32.totalorder %v1651_v19, %v1572_v12 }
  0x15   :  { %1349 = vmatpush1.bf16.msk.msra.mxu1 %vm1348_vm7, %v1490_v14  ;;  %vm1318_vm10 = vmpackc.low %vm73_vm3, %vm71_vm2  ;;  %vm254_vm2 = vcmp.eq.s32.totalorder %v1654_v20, %v1569_v11  ;;  %vm251_vm7 = vcmp.eq.s32.totalorder %v1651_v19, %v1575_v13 }
  0x16   :  { %1319 = vmatprep.subr.msk.bf16.mxu0 %vm1318_vm10, %v1490_v14  ;;  %vm1350_vm13 = vmpackc.low %vm250_vm6, %vm248_vm5  ;;  %vm76_vm5 = vcmp.eq.s32.totalorder %v1654_v20, %v1572_v12  ;;  %vm79_vm10 = vcmp.eq.s32.totalorder %v1677_v21, %v1566_v10 }
  0x17   :  { %1351 = vmatprep.subr.msk.bf16.mxu1 %vm1350_vm13, %v1490_v14  ;;  %vm1320_vm0 = vmpackc.low %vm72_vm9, %vm70_vm8  ;;  %vm253_vm8 = vcmp.eq.s32.totalorder %v1654_v20, %v1575_v13  ;;  %vm256_vm13 = vcmp.eq.s32.totalorder %v1677_v21, %v1569_v11 }
  0x18   :  { %1321 = vmatpush1.bf16.msk.msra.mxu0 %vm1320_vm0, %v1490_v14  ;;  %vm1352_vm3 = vmpackc.low %vm249_vm12, %vm247_vm11  ;;  %vm81_vm11 = vcmp.eq.s32.totalorder %v1680_v22, %v1566_v10  ;;  %vm78_vm0 = vcmp.eq.s32.totalorder %v1677_v21, %v1572_v12 }
  0x19   :  { %1353 = vmatpush1.bf16.msk.msra.mxu1 %vm1352_vm3, %v1490_v14  ;;  %vm1322_vm6 = vmpackc.low %vm77_vm15, %vm75_vm14  ;;  %vm258_vm14 = vcmp.eq.s32.totalorder %v1680_v22, %v1569_v11  ;;  %vm255_vm3 = vcmp.eq.s32.totalorder %v1677_v21, %v1575_v13 }
  0x1a   :  { %1323 = vmatprep.subr.msk.bf16.mxu0 %vm1322_vm6, %v1490_v14  ;;  %vm1354_vm9 = vmpackc.low %vm254_vm2, %vm252_vm1  ;;  %vm80_vm1 = vcmp.eq.s32.totalorder %v1680_v22, %v1572_v12  ;;  %vm83_vm6 = vcmp.eq.s32.totalorder %v1703_v23, %v1566_v10 }
  0x1b   :  { %1355 = vmatprep.subr.msk.bf16.mxu1 %vm1354_vm9, %v1490_v14  ;;  %vm1324_vm12 = vmpackc.low %vm76_vm5, %vm74_vm4  ;;  %vm257_vm4 = vcmp.eq.s32.totalorder %v1680_v22, %v1575_v13  ;;  %vm260_vm9 = vcmp.eq.s32.totalorder %v1703_v23, %v1569_v11 }
  0x1c   :  { %1325 = vmatpush1.bf16.msk.msra.mxu0 %vm1324_vm12, %v1490_v14  ;;  %vm1356_vm15 = vmpackc.low %vm253_vm8, %vm251_vm7  ;;  %vm85_vm7 = vcmp.eq.s32.totalorder %v1706_v24, %v1566_v10  ;;  %vm82_vm12 = vcmp.eq.s32.totalorder %v1703_v23, %v1572_v12 }
  0x1d   :  { %1357 = vmatpush1.bf16.msk.msra.mxu1 %vm1356_vm15, %v1490_v14  ;;  %vm1326_vm2 = vmpackc.low %vm81_vm11, %vm79_vm10  ;;  %vm262_vm10 = vcmp.eq.s32.totalorder %v1706_v24, %v1569_v11  ;;  %vm259_vm15 = vcmp.eq.s32.totalorder %v1703_v23, %v1575_v13 }
  0x1e   :  { %1327 = vmatprep.subr.msk.bf16.mxu0 %vm1326_vm2, %v1490_v14  ;;  %vm1358_vm5 = vmpackc.low %vm258_vm14, %vm256_vm13  ;;  %vm84_vm13 = vcmp.eq.s32.totalorder %v1706_v24, %v1572_v12  ;;  %vm87_vm2 = vcmp.eq.s32.totalorder %v1729_v25, %v1566_v10 }
  0x1f   :  { %1359 = vmatprep.subr.msk.bf16.mxu1 %vm1358_vm5, %v1490_v14  ;;  %vm1328_vm8 = vmpackc.low %vm80_vm1, %vm78_vm0  ;;  %vm261_vm0 = vcmp.eq.s32.totalorder %v1706_v24, %v1575_v13  ;;  %vm264_vm5 = vcmp.eq.s32.totalorder %v1729_v25, %v1569_v11 }
  0x20   :  { %1329 = vmatpush1.bf16.msk.msra.mxu0 %vm1328_vm8, %v1490_v14  ;;  %vm1360_vm11 = vmpackc.low %vm257_vm4, %vm255_vm3  ;;  %vm89_vm3 = vcmp.eq.s32.totalorder %v1732_v26, %v1566_v10  ;;  %vm86_vm8 = vcmp.eq.s32.totalorder %v1729_v25, %v1572_v12  ;;  %v873_v10 = vld [vmem:[%s2021_s5 + $0x8] sm:$0xff] }
  0x21   :  { %1361 = vmatpush1.bf16.msk.msra.mxu1 %vm1360_vm11, %v1490_v14  ;;  %vm1330_vm14 = vmpackc.low %vm85_vm7, %vm83_vm6  ;;  %vm266_vm6 = vcmp.eq.s32.totalorder %v1732_v26, %v1569_v11  ;;  %vm263_vm11 = vcmp.eq.s32.totalorder %v1729_v25, %v1575_v13  ;;  %v973_v11 = vld [vmem:[%s2022_s6 + $0x8] sm:$0xff] }
  0x22   :  { %1331 = vmatprep.subr.msk.bf16.mxu0 %vm1330_vm14, %v1490_v14  ;;  %vm1362_vm1 = vmpackc.low %vm262_vm10, %vm260_vm9  ;;  %vm88_vm9 = vcmp.eq.s32.totalorder %v1732_v26, %v1572_v12  ;;  %vm413_vm14 = vcmp.eq.s32.totalorder %v1542_v2, %v1764_v29 }
  0x23   :  { %1363 = vmatprep.subr.msk.bf16.mxu1 %vm1362_vm1, %v1490_v14  ;;  %vm1332_vm4 = vmpackc.low %vm84_vm13, %vm82_vm12  ;;  %vm265_vm12 = vcmp.eq.s32.totalorder %v1732_v26, %v1575_v13  ;;  %vm590_vm1 = vcmp.eq.s32.totalorder %v1542_v2, %v1772_v30 }
  0x24   :  { %1333 = vmatpush1.bf16.msk.msra.mxu0 %vm1332_vm4, %v1490_v14  ;;  %vm1364_vm7 = vmpackc.low %vm261_vm0, %vm259_vm15  ;;  %vm415_vm15 = vcmp.eq.s32.totalorder %v1551_v5, %v1764_v29  ;;  %vm412_vm4 = vcmp.eq.s32.totalorder %v1542_v2, %v1780_v31 }
  0x25   :  { %1365 = vmatpush1.bf16.msk.msra.mxu1 %vm1364_vm7, %v1490_v14  ;;  %vm1334_vm10 = vmpackc.low %vm89_vm3, %vm87_vm2  ;;  %vm592_vm2 = vcmp.eq.s32.totalorder %v1551_v5, %v1772_v30  ;;  %vm589_vm7 = vcmp.eq.s32.totalorder %v1542_v2, %v1788_v32 }
  0x26   :  { %1335 = vmatprep.subr.msk.bf16.mxu0 %vm1334_vm10, %v1490_v14  ;;  %vm1366_vm13 = vmpackc.low %vm266_vm6, %vm264_vm5  ;;  %vm414_vm5 = vcmp.eq.s32.totalorder %v1551_v5, %v1780_v31  ;;  %vm417_vm10 = vcmp.eq.s32.totalorder %v1560_v8, %v1764_v29 }
  0x27   :  { %1367 = vmatprep.subr.msk.bf16.mxu1 %vm1366_vm13, %v1490_v14  ;;  %vm1336_vm0 = vmpackc.low %vm88_vm9, %vm86_vm8  ;;  %vm591_vm8 = vcmp.eq.s32.totalorder %v1551_v5, %v1788_v32  ;;  %vm594_vm13 = vcmp.eq.s32.totalorder %v1560_v8, %v1772_v30 }
  0x28   :  { %1337 = vmatpush1.bf16.msk.msra.mxu0 %vm1336_vm0, %v1490_v14  ;;  %vm1368_vm3 = vmpackc.low %vm265_vm12, %vm263_vm11  ;;  %vm419_vm11 = vcmp.eq.s32.totalorder %v1563_v9, %v1764_v29  ;;  %vm416_vm0 = vcmp.eq.s32.totalorder %v1560_v8, %v1780_v31 }
  0x29   :  { %1369 = vmatpush1.bf16.msk.msra.mxu1 %vm1368_vm3, %v1490_v14  ;;  %vm1370_vm6 = vmpackc.low %vm415_vm15, %vm413_vm14  ;;  %vm596_vm14 = vcmp.eq.s32.totalorder %v1563_v9, %v1772_v30  ;;  %vm593_vm3 = vcmp.eq.s32.totalorder %v1560_v8, %v1788_v32  ;;  %v769_v8 = vld [vmem:[%s2018_s2 + $0x8] sm:$0xff] }
  0x2a   :  { %1371 = vmatprep.subr.msk.bf16.mxu0 %vm1370_vm6, %v1490_v14  ;;  %vm1402_vm9 = vmpackc.low %vm592_vm2, %vm590_vm1  ;;  %vm418_vm1 = vcmp.eq.s32.totalorder %v1563_v9, %v1780_v31  ;;  %vm421_vm6 = vcmp.eq.s32.totalorder %v1599_v15, %v1764_v29 }
  0x2b   :  { %219 = vmatmul.mubr.f32.vlgmr.msra.gmra.mrb[0].mxu0 %v1804_v33  ;;  %1403 = vmatprep.subr.msk.bf16.mxu1 %vm1402_vm9, %v1490_v14  ;;  %vm1372_vm12 = vmpackc.low %vm414_vm5, %vm412_vm4  ;;  %vm595_vm4 = vcmp.eq.s32.totalorder %v1563_v9, %v1788_v32  ;;  %vm598_vm9 = vcmp.eq.s32.totalorder %v1599_v15, %v1772_v30  ;;  %v872_v9 = vld [vmem:[%s2021_s5] sm:$0xff] }
  0x2c   :  { %396 = vmatmul.mubr.f32.vlgmr.msra.gmra.mrb[0].mxu1 %v1804_v33  ;;  %1373 = vmatpush1.bf16.msk.msra.mxu0 %vm1372_vm12, %v1490_v14  ;;  %vm1404_vm15 = vmpackc.low %vm591_vm8, %vm589_vm7  ;;  %vm423_vm7 = vcmp.eq.s32.totalorder %v1602_v16, %v1764_v29  ;;  %vm420_vm12 = vcmp.eq.s32.totalorder %v1599_v15, %v1780_v31 }
  0x2d   :  { %1405 = vmatpush1.bf16.msk.msra.mxu1 %vm1404_vm15, %v1490_v14  ;;  %vm1374_vm2 = vmpackc.low %vm419_vm11, %vm417_vm10  ;;  %572 = vmatprep.mubr.f32.mxu0 %v1489_v1  ;;  %vm600_vm10 = vcmp.eq.s32.totalorder %v1602_v16, %v1772_v30  ;;  %vm597_vm15 = vcmp.eq.s32.totalorder %v1599_v15, %v1788_v32 }
  0x2e   :  { %1375 = vmatprep.subr.msk.bf16.mxu0 %vm1374_vm2, %v1490_v14  ;;  %vm1406_vm5 = vmpackc.low %vm596_vm14, %vm594_vm13  ;;  %749 = vmatprep.mubr.f32.mxu1 %v1489_v1  ;;  %vm422_vm13 = vcmp.eq.s32.totalorder %v1602_v16, %v1780_v31  ;;  %vm425_vm2 = vcmp.eq.s32.totalorder %v1625_v17, %v1764_v29 }
  0x2f   :  { %1407 = vmatprep.subr.msk.bf16.mxu1 %vm1406_vm5, %v1490_v14  ;;  %vm1376_vm8 = vmpackc.low %vm418_vm1, %vm416_vm0  ;;  %vm599_vm0 = vcmp.eq.s32.totalorder %v1602_v16, %v1788_v32  ;;  %vm602_vm5 = vcmp.eq.s32.totalorder %v1625_v17, %v1772_v30  ;;  %876 = vperm.xlu1 %1464, %v872_v9  }
  0x30   :  { %1377 = vmatpush1.bf16.msk.msra.mxu0 %vm1376_vm8, %v1490_v14  ;;  %vm1408_vm11 = vmpackc.low %vm595_vm4, %vm593_vm3  ;;  %vm427_vm3 = vcmp.eq.s32.totalorder %v1628_v18, %v1764_v29  ;;  %vm424_vm8 = vcmp.eq.s32.totalorder %v1625_v17, %v1780_v31 }
  0x31   :  { %1409 = vmatpush1.bf16.msk.msra.mxu1 %vm1408_vm11, %v1490_v14  ;;  %vm1378_vm14 = vmpackc.low %vm423_vm7, %vm421_vm6  ;;  %vm604_vm6 = vcmp.eq.s32.totalorder %v1628_v18, %v1772_v30  ;;  %vm601_vm11 = vcmp.eq.s32.totalorder %v1625_v17, %v1788_v32 }
  0x32   :  { %1379 = vmatprep.subr.msk.bf16.mxu0 %vm1378_vm14, %v1490_v14  ;;  %vm1410_vm1 = vmpackc.low %vm600_vm10, %vm598_vm9  ;;  %vm426_vm9 = vcmp.eq.s32.totalorder %v1628_v18, %v1780_v31  ;;  %vm429_vm14 = vcmp.eq.s32.totalorder %v1651_v19, %v1764_v29 }
  0x33   :  { %1411 = vmatprep.subr.msk.bf16.mxu1 %vm1410_vm1, %v1490_v14  ;;  %vm1380_vm4 = vmpackc.low %vm422_vm13, %vm420_vm12  ;;  %vm603_vm12 = vcmp.eq.s32.totalorder %v1628_v18, %v1788_v32  ;;  %vm606_vm1 = vcmp.eq.s32.totalorder %v1651_v19, %v1772_v30  ;;  %881 = vperm.xlu1 %1464, %v873_v10  }
  0x34   :  { %1381 = vmatpush1.bf16.msk.msra.mxu0 %vm1380_vm4, %v1490_v14  ;;  %vm1412_vm7 = vmpackc.low %vm599_vm0, %vm597_vm15  ;;  %vm431_vm15 = vcmp.eq.s32.totalorder %v1654_v20, %v1764_v29  ;;  %vm428_vm4 = vcmp.eq.s32.totalorder %v1651_v19, %v1780_v31 }
  0x35   :  { %1413 = vmatpush1.bf16.msk.msra.mxu1 %vm1412_vm7, %v1490_v14  ;;  %vm1382_vm10 = vmpackc.low %vm427_vm3, %vm425_vm2  ;;  %vm608_vm2 = vcmp.eq.s32.totalorder %v1654_v20, %v1772_v30  ;;  %vm605_vm7 = vcmp.eq.s32.totalorder %v1651_v19, %v1788_v32 }
  0x36   :  { %1383 = vmatprep.subr.msk.bf16.mxu0 %vm1382_vm10, %v1490_v14  ;;  %vm1414_vm13 = vmpackc.low %vm604_vm6, %vm602_vm5  ;;  %vm430_vm5 = vcmp.eq.s32.totalorder %v1654_v20, %v1780_v31  ;;  %vm433_vm10 = vcmp.eq.s32.totalorder %v1677_v21, %v1764_v29 }
  0x37   :  { %1415 = vmatprep.subr.msk.bf16.mxu1 %vm1414_vm13, %v1490_v14  ;;  %vm1384_vm0 = vmpackc.low %vm426_vm9, %vm424_vm8  ;;  %vm607_vm8 = vcmp.eq.s32.totalorder %v1654_v20, %v1788_v32  ;;  %vm610_vm13 = vcmp.eq.s32.totalorder %v1677_v21, %v1772_v30  ;;  %981 = vperm.xlu1 %1464, %v973_v11  }
  0x38   :  { %1385 = vmatpush1.bf16.msk.msra.mxu0 %vm1384_vm0, %v1490_v14  ;;  %vm1416_vm3 = vmpackc.low %vm603_vm12, %vm601_vm11  ;;  %vm435_vm11 = vcmp.eq.s32.totalorder %v1680_v22, %v1764_v29  ;;  %vm432_vm0 = vcmp.eq.s32.totalorder %v1677_v21, %v1780_v31 }
  0x39   :  { %1417 = vmatpush1.bf16.msk.msra.mxu1 %vm1416_vm3, %v1490_v14  ;;  %vm1386_vm6 = vmpackc.low %vm431_vm15, %vm429_vm14  ;;  %vm612_vm14 = vcmp.eq.s32.totalorder %v1680_v22, %v1772_v30  ;;  %vm609_vm3 = vcmp.eq.s32.totalorder %v1677_v21, %v1788_v32 }
  0x3a   :  { %1387 = vmatprep.subr.msk.bf16.mxu0 %vm1386_vm6, %v1490_v14  ;;  %vm1418_vm9 = vmpackc.low %vm608_vm2, %vm606_vm1  ;;  %vm434_vm1 = vcmp.eq.s32.totalorder %v1680_v22, %v1780_v31  ;;  %vm437_vm6 = vcmp.eq.s32.totalorder %v1703_v23, %v1764_v29 }
  0x3b   :  { %1419 = vmatprep.subr.msk.bf16.mxu1 %vm1418_vm9, %v1490_v14  ;;  %vm1388_vm12 = vmpackc.low %vm430_vm5, %vm428_vm4  ;;  %vm611_vm4 = vcmp.eq.s32.totalorder %v1680_v22, %v1788_v32  ;;  %vm614_vm9 = vcmp.eq.s32.totalorder %v1703_v23, %v1772_v30 }
  0x3c   :  { %1389 = vmatpush1.bf16.msk.msra.mxu0 %vm1388_vm12, %v1490_v14  ;;  %vm1420_vm15 = vmpackc.low %vm607_vm8, %vm605_vm7  ;;  %vm439_vm7 = vcmp.eq.s32.totalorder %v1706_v24, %v1764_v29  ;;  %vm436_vm12 = vcmp.eq.s32.totalorder %v1703_v23, %v1780_v31 }
  0x3d   :  { %1421 = vmatpush1.bf16.msk.msra.mxu1 %vm1420_vm15, %v1490_v14  ;;  %vm1390_vm2 = vmpackc.low %vm435_vm11, %vm433_vm10  ;;  %vm616_vm10 = vcmp.eq.s32.totalorder %v1706_v24, %v1772_v30  ;;  %vm613_vm15 = vcmp.eq.s32.totalorder %v1703_v23, %v1788_v32 }
  0x3e   :  { %1391 = vmatprep.subr.msk.bf16.mxu0 %vm1390_vm2, %v1490_v14  ;;  %vm1422_vm5 = vmpackc.low %vm612_vm14, %vm610_vm13  ;;  %vm438_vm13 = vcmp.eq.s32.totalorder %v1706_v24, %v1780_v31  ;;  %vm441_vm2 = vcmp.eq.s32.totalorder %v1729_v25, %v1764_v29 }
  0x3f   :  { %1423 = vmatprep.subr.msk.bf16.mxu1 %vm1422_vm5, %v1490_v14  ;;  %vm1392_vm8 = vmpackc.low %vm434_vm1, %vm432_vm0  ;;  %vm615_vm0 = vcmp.eq.s32.totalorder %v1706_v24, %v1788_v32  ;;  %vm618_vm5 = vcmp.eq.s32.totalorder %v1729_v25, %v1772_v30 }
  0x40   :  { %1393 = vmatpush1.bf16.msk.msra.mxu0 %vm1392_vm8, %v1490_v14  ;;  %vm1424_vm11 = vmpackc.low %vm611_vm4, %vm609_vm3  ;;  %vm443_vm3 = vcmp.eq.s32.totalorder %v1732_v26, %v1764_v29  ;;  %vm440_vm8 = vcmp.eq.s32.totalorder %v1729_v25, %v1780_v31  ;;  %v871_v29 = vld [vmem:[%s2020_s4 + $0x8] sm:$0xff] }
  0x41   :  { %1425 = vmatpush1.bf16.msk.msra.mxu1 %vm1424_vm11, %v1490_v14  ;;  %vm1394_vm14 = vmpackc.low %vm439_vm7, %vm437_vm6  ;;  %vm620_vm6 = vcmp.eq.s32.totalorder %v1732_v26, %v1772_v30  ;;  %vm617_vm11 = vcmp.eq.s32.totalorder %v1729_v25, %v1788_v32 }
  0x42   :  { %1395 = vmatprep.subr.msk.bf16.mxu0 %vm1394_vm14, %v1490_v14  ;;  %vm1426_vm1 = vmpackc.low %vm616_vm10, %vm614_vm9  ;;  %vm442_vm9 = vcmp.eq.s32.totalorder %v1732_v26, %v1780_v31 }
  0x43   :  { %1427 = vmatprep.subr.msk.bf16.mxu1 %vm1426_vm1, %v1490_v14  ;;  %vm1396_vm4 = vmpackc.low %vm438_vm13, %vm436_vm12  ;;  %vm619_vm12 = vcmp.eq.s32.totalorder %v1732_v26, %v1788_v32  ;;  %vm884_vm1 = vcmask 130048  }
  0x44   :  { %1397 = vmatpush1.bf16.msk.msra.mxu0 %vm1396_vm4, %v1490_v14  ;;  %vm1428_vm7 = vmpackc.low %vm615_vm0, %vm613_vm15  ;;  %vm782_vm0 = vcmask 654336  }
  0x45   :  { %1429 = vmatpush1.bf16.msk.msra.mxu1 %vm1428_vm7, %v1490_v14  ;;  %vm1398_vm10 = vmpackc.low %vm443_vm3, %vm441_vm2  ;;  %vm1026_vm2 = vcmp.lt.s32.totalorder %v32_v0, 256 }
  0x46   :  { %1399 = vmatprep.subr.msk.bf16.mxu0 %vm1398_vm10, %v1490_v14  ;;  %vm1430_vm13 = vmpackc.low %vm620_vm6, %vm618_vm5 }
  0x47   :  { %1431 = vmatprep.subr.msk.bf16.mxu1 %vm1430_vm13, %v1490_v14  ;;  %vm1400_vm14 = vmpackc.low %vm442_vm9, %vm440_vm8 }
  0x48   :  { %1401 = vmatpush1.bf16.msk.msra.mxu0 %vm1400_vm14, %v1490_v14  ;;  %vm1432_vm15 = vmpackc.low %vm619_vm12, %vm617_vm11 }
  0x49   :  { %1433 = vmatpush1.bf16.msk.msra.mxu1 %vm1432_vm15, %v1490_v14 }
  0x4b   :  { %573 = vmatmul.mubr.f32.vlgmr.msra.gmra.mrb[2].mxu0 %v1804_v33 }
  0x4c   :  { %750 = vmatmul.mubr.f32.vlgmr.msra.gmra.mrb[2].mxu1 %v1804_v33  ;;  %853 = vmatprep.mubr.f32.mxu0 %v1489_v1 }
  0x4d   :  { %955 = vmatprep.mubr.f32.mxu1 %v1489_v1 }
  0x85   :  { %v775_v12 = vpop.permute.xlu0 %774 }
  0x8c   :  { %v780_v16 = vpop.permute.xlu0 %779 }
  0xae   :  { %v877_v30 = vpop.permute.xlu1 %876 }
  0xb2   :  { %v882_v34 = vpop.permute.xlu1 %881 }
  0xfe   :  { %v220_v38 = vpop.f32.mrb[0].mxu0 }
  0xff   :  { %v397_v39 = vpop.f32.mrb[0].mxu1  ;;  %v222_v40 = vpop.f32.mrb[1].mxu0 }
 0x100   :  { %v756_v41 = vmul.f32 %v397_v39, %v220_v38  ;;  %v1436_v42 = vpack.c.bf16 %v397_v39, %v220_v38  ;;  %v399_v43 = vpop.f32.mrb[1].mxu1 }
 0x101   :  { %v757_v44 = vmul.f32 %v399_v43, %v222_v40  ;;  %v1434_v45 = vpack.c.bf16 %v399_v43, %v222_v40 }
 0x103   :  { %1435 = vmatprep.subr.bf16.mxu0 %v1434_v45 }
 0x104   :  { %1437 = vmatpush1.bf16.msra.mxu0 %v1436_v42 }
 0x11e   :  { %v574_v46 = vpop.f32.mrb[2].mxu0 }
 0x11f   :  { %v758_v47 = vmul.f32 %v574_v46, %v220_v38  ;;  %v762_v48 = vmul.f32 %v574_v46, %v397_v39  ;;  %v751_v49 = vpop.f32.mrb[2].mxu1  ;;  %v576_v50 = vpop.f32.mrb[3].mxu0 }
 0x120   :  { %v760_v51 = vmul.f32 %v751_v49, %v220_v38  ;;  %v764_v52 = vmul.f32 %v751_v49, %v397_v39  ;;  %v766_v53 = vmul.f32 %v751_v49, %v574_v46  ;;  %v1440_v54 = vpack.c.bf16 %v751_v49, %v574_v46  ;;  %v753_v55 = vpop.f32.mrb[3].mxu1 }
 0x121   :  { %v759_v56 = vmul.f32 %v576_v50, %v222_v40  ;;  %v763_v57 = vmul.f32 %v576_v50, %v399_v43  ;;  %v761_v58 = vmul.f32 %v753_v55, %v222_v40  ;;  %v765_v59 = vmul.f32 %v753_v55, %v399_v43  ;;  %v977_v43 = vpop.permute.xlu0 %976 }
 0x122   :  { %v767_v60 = vmul.f32 %v753_v55, %v576_v50  ;;  %v1438_v61 = vpack.c.bf16 %v753_v55, %v576_v50  ;;  %v1444_v62 = vpack.c.bf16 %v758_v47, %v756_v41  ;;  %v1448_v63 = vpack.c.bf16 %v762_v48, %v760_v51 }
 0x123   :  { %v1442_v3 = vpack.c.bf16 %v759_v56, %v757_v44  ;;  %v1446_v4 = vpack.c.bf16 %v763_v57, %v761_v58  ;;  %v1452_v5 = vpack.c.bf16 %v766_v53, %v764_v52  ;;  %v1492_v57 = vmov 1966171168  }
 0x124   :  { %1439 = vmatprep.subr.bf16.mxu0 %v1438_v61  ;;  %v1450_v6 = vpack.c.bf16 %v767_v60, %v765_v59  ;;  %v1010_v58 = vunpack.c.l.s4 %v1492_v57 }
 0x125   :  { %1441 = vmatpush1.bf16.msra.mxu0 %v1440_v54 }
 0x126   :  { %1443 = vmatprep.subr.bf16.mxu0 %v1442_v3  ;;  %v1011_v3 = vunpack.c.0.s8 %v1010_v58 }
 0x129   :  { %1445 = vmatpush1.bf16.msra.mxu0 %v1444_v62 }
 0x12a   :  { %1447 = vmatprep.subr.bf16.mxu0 %v1446_v4 }
 0x12d   :  { %1449 = vmatpush1.bf16.msra.mxu0 %v1448_v63  ;;  %v1003_v63 = vstv %s2023_s7 }
 0x12e   :  { %1451 = vmatprep.subr.bf16.mxu0 %v1450_v6 }
 0x131   :  { %1453 = vmatpush1.bf16.msra.mxu0 %v1452_v5 }
 0x134   :  { %1302 = vmatmul.mubr.msk.f32.vlgmr.msra.gmra.mrb[4].mxu0 %vm782_vm0, %v768_v7 }
 0x135   :  { %859 = vmatprep.mubr.f32.mxu0 %v1489_v1 }
 0x138   :  { %1303 = vmatmul.mubr.msk.f32.gmra.mrb[6].mxu0 %vm782_vm0, %v769_v8  ;;  %v1014_v8 = vsub.s32 %v1011_v3, %v1542_v2 }
 0x207   :  { %v855_v13 = vpop.f32.mrb[4].mxu0 }
 0x208   :  { %v857_v14 = vpop.f32.mrb[5].mxu0  ;;  %v856_v15 = vadd.f32 %v855_v13, %v775_v12 }
 0x209   :  { %v858_v17 = vadd.f32 %v857_v14, %v775_v12 }
 0x20a   :  { %v866_v22 = vmax.f32 %v856_v15, 0.0 }
 0x20b   :  { %v861_v18 = vpop.f32.mrb[6].mxu0  ;;  %v867_v24 = vmax.f32 %v858_v17, 0.0 }
 0x20c   :  { %v862_v19 = vadd.f32 %v861_v18, %v780_v16  ;;  %v863_v20 = vpop.f32.mrb[7].mxu0 }
 0x20d   :  { %v864_v21 = vadd.f32 %v863_v20, %v780_v16 }
 0x20e   :  { %v868_v23 = vmax.f32 %v862_v19, 0.0 }
 0x20f   :  { %v869_v25 = vmax.f32 %v864_v21, 0.0 }
 0x210   :  { %v1456_v26 = vpack.c.bf16 %v868_v23, %v866_v22 }
 0x211   :  { %v1454_v27 = vpack.c.bf16 %v869_v25, %v867_v24 }
 0x213   :  { %1455 = vmatprep.subr.bf16.mxu1 %v1454_v27 }
 0x214   :  { %1457 = vmatpush1.bf16.msra.mxu1 %v1456_v26 }
 0x217   :  { %1304 = vmatmul.mubr.msk.f32.vlgmr.msra.gmra.mrb[4].mxu1 %vm884_vm1, %v870_v28 }
 0x218   :  { %961 = vmatprep.mubr.f32.mxu1 %v1489_v1  ;;  %v982_v1 = vpop.permute.xlu1 %981 }
 0x21b   :  { %1305 = vmatmul.mubr.msk.f32.gmra.mrb[6].mxu1 %vm884_vm1, %v871_v29 }
 0x2ea   :  { %v957_v31 = vpop.f32.mrb[4].mxu1 }
 0x2eb   :  { %v958_v32 = vadd.f32 %v957_v31, %v877_v30  ;;  %v959_v33 = vpop.f32.mrb[5].mxu1 }
 0x2ec   :  { %v960_v35 = vadd.f32 %v959_v33, %v877_v30 }
 0x2ed   :  { %v968_v37 = vmax.f32 %v958_v32, 0.0 }
 0x2ee   :  { %v963_v36 = vpop.f32.mrb[6].mxu1  ;;  %v969_v40 = vmax.f32 %v960_v35, 0.0 }
 0x2ef   :  { %v964_v38 = vadd.f32 %v963_v36, %v882_v34  ;;  %v965_v39 = vpop.f32.mrb[7].mxu1  ;;  %v984_v45 = vmul.f32 %v977_v43, %v968_v37 }
 0x2f0   :  { %v966_v41 = vadd.f32 %v965_v39, %v882_v34  ;;  %v985_v47 = vmul.f32 %v977_v43, %v969_v40 }
 0x2f1   :  { %v970_v42 = vmax.f32 %v964_v38, 0.0 }
 0x2f2   :  { %v971_v44 = vmax.f32 %v966_v41, 0.0 }
 0x2f3   :  { %v986_v46 = vmul.f32 %v982_v1, %v970_v42 }
 0x2f4   :  { %v987_v48 = vmul.f32 %v982_v1, %v971_v44 }
 0x2f5   :  { %v988_v49 = vadd.f32 %v986_v46, %v984_v45 }
 0x2f6   :  { %v995_v50 = vadd.f32 %v987_v48, %v985_v47 }
 0x2f7   :  { %v989_v51 = vrot.slane %v988_v49, 4 }
 0x2f8   :  { %v996_v52 = vrot.slane %v995_v50, 4 }
 0x2f9   :  { %v990_v53 = vadd.f32 %v989_v51, %v988_v49 }
 0x2fa   :  { %v997_v54 = vadd.f32 %v996_v52, %v995_v50 }
 0x2fb   :  { %v991_v55 = vrot.slane %v990_v53, 2 }
 0x2fc   :  { %v998_v56 = vrot.slane %v997_v54, 2 }
 0x2fd   :  { %v992_v59 = vadd.f32 %v991_v55, %v990_v53 }
 0x2fe   :  { %v999_v60 = vadd.f32 %v998_v56, %v997_v54 }
 0x2ff   :  { %v993_v61 = vrot.slane %v992_v59, 1 }
 0x300   :  { %v1000_v62 = vrot.slane %v999_v60, 1 }
 0x301   :  { %v994_v4 = vadd.f32 %v993_v61, %v992_v59 }
 0x302   :  { %v1001_v5 = vadd.f32 %v1000_v62, %v999_v60 }
 0x303   :  { %v1004_v6 = vadd.f32 %v1003_v63, %v994_v4 }
 0x304   :  { %v1005_v7 = vadd.f32 %v1003_v63, %v1001_v5 }
 0x306   :  { %v1008_v9 = vcombine.low %v1004_v6, %v1005_v7 }
 0x308   :  { %v1015_v10 = vrot.slane %v1008_v9, %v1014_v8 }
 0x30a   :  { %v1022_v11 = vrot.slane %v1015_v10, %v1014_v8 }
 0x30c   :  { %1028 = vst.msk [vmem:[#allocation3] sm:$0x3] %vm1026_vm2, %v1022_v11 }
 0x30d   :  { %1476 = shalt.err (!%p1473_p4)
}
 0x30e   :  { %s1477_s12 = scalar_lea.hbm %s2024_s8, 32 }
 0x30f   :  { %p1478_p5 = scmp.ne.s32.totalorder %s2024_s8, %s1477_s12  ;;  %p1481_p6 = scmp.lt.u32.totalorder %s1477_s12, %s2024_s8 }
 0x311   :  { %p1483_p7 = pnand %p1481_p6, %p1478_p5 }
 0x313   :  { %1486 = shalt.err (!%p1483_p7)
}
 0x314   :  { %1038 = dma.vmem_to_hbm [thread:$0]  %s1036_s9, 32, %s2024_s8, [#allocation4]  }
 0x315   :  { %1487 = dma.done.wait [#allocation4], 32  }
 0x316   :  { %1488 = vsyncadd [#allocation4], 4294967264 }
 0x317   :  { %1042 = vsyncpa [#allocation4], 1 }

</bundles_post_ra>
